<compile_context>
chip_gen: v6e
topology: v6e:2x2x1
jax: 0.10.0
libtpu: 0.0.40
codegen_flags: <defaults>
</compile_context>

<pallas_src>
import functools

import jax
import jax.numpy as jnp
from jax.experimental import pallas as pl
from jax.experimental.pallas import tpu as pltpu

STATE_DIM = 8
ACTION_DIM = 1
H1 = 256
H2 = 128
OUT = 1
_LANE = 128


def _round_up(n, m):
    return (n + m - 1) // m * m


def _cdiv(a, b):
    return -(-a // b)


def critic_kernel(x_ref, u_ref, w1a_ref, w1b_ref, b1_ref, w2_ref, b2_ref,
                  w3_ref, b3_ref, q_ref):
    # ---- layer 1: cat([x, u]) @ W1 without materializing the concat --------
    # state columns (K=8) on the MXU (bf16 operands, f32 accumulate); the
    # single action column is a (TB,1)*(1,H1) f32 broadcast FMA on the VPU.
    h1 = jnp.dot(x_ref[...].astype(jnp.bfloat16), w1a_ref[...],
                 preferred_element_type=jnp.float32)
    h1 = h1 + u_ref[...] * w1b_ref[...]
    h1 = jnp.maximum(h1 + b1_ref[...], 0.0)

    # ---- layer 2 + relu (MXU, bf16 operands, f32 accumulate) ---------------
    h2 = jnp.dot(h1.astype(jnp.bfloat16), w2_ref[...],
                 preferred_element_type=jnp.float32)
    h2 = jnp.maximum(h2 + b2_ref[...], 0.0)

    # ---- layer 3: single output column -------------------------------------
    # Broadcast-mul + cross-lane reduce (VPU + XLU), all f32.  Produces the
    # (TB, 1) result directly, so the HBM writeback is 4 B/row instead of a
    # 128-lane padded store.
    q = jnp.sum(h2 * w3_ref[...], axis=-1, keepdims=True) + b3_ref[...]
    q_ref[...] = q.astype(q_ref.dtype)


def prepare_params(params):
    """One-time conversion of Linear params (stored [in, out]) to kernel form."""
    w1, b1, w2, b2, w3, b3 = params
    w1a = jnp.asarray(w1[:STATE_DIM], jnp.bfloat16)        # (8, 256)   MXU
    w1b = jnp.asarray(w1[STATE_DIM:], jnp.float32)         # (1, 256)   VPU FMA
    b1p = jnp.asarray(b1, jnp.float32).reshape(1, H1)
    w2p = jnp.asarray(w2, jnp.bfloat16)                     # (256, 128) MXU
    b2p = jnp.asarray(b2, jnp.float32).reshape(1, H2)
    w3r = jnp.asarray(w3, jnp.float32).reshape(1, H2)       # (1, 128)   row form
    b3p = jnp.asarray(b3, jnp.float32).reshape(1, 1)
    return (w1a, w1b, b1p, w2p, b2p, w3r, b3p)


def _pick_tile(batch, block_b):
    """Batch tile: whole batch if it fits, else balanced MXU-aligned tiles."""
    if batch <= block_b:
        return _round_up(batch, 8)
    n_tiles = _cdiv(batch, block_b)
    align = 256 if block_b % 256 == 0 else 8
    return _round_up(_cdiv(batch, n_tiles), align)


@functools.partial(jax.jit, static_argnames=("block_b", "core_parallel"))
def critic_forward(x, u, prepared, *, block_b=2048, core_parallel=False):
    """x: [B, 8], u: [B, 1], prepared = prepare_params(...) -> q: [B, 1]."""
    w1a, w1b, b1, w2, b2, w3r, b3 = prepared
    batch = x.shape[0]

    tb = _pick_tile(batch, block_b)
    b_pad = _round_up(batch, tb)
    if b_pad != batch:
        x = jnp.pad(x, ((0, b_pad - batch), (0, 0)))
        u = jnp.pad(u, ((0, b_pad - batch), (0, 0)))

    # VMEM budget from actual buffer sizes: the narrow (tb,8)/(tb,1)/(tb,1)
    # tiles are lane-padded to 128 lanes in VMEM and double-buffered; h1/h2
    # plus their bf16 staging copies are live per tile; weights are resident.
    tile_io = 3 * 2 * tb * _LANE * 4
    interm = tb * (H1 * (4 + 2) + H2 * (4 + 2))
    weights = 2 * (STATE_DIM * H1 * 2 + 2 * H1 * 4 + H1 * H2 * 2
                   + 2 * H2 * 4 + H2 * 4 + 4)
    vmem_limit = max(16 << 20,
                     min(int(1.5 * (tile_io + interm + weights)) + (2 << 20),
                         48 << 20))

    # "parallel" everywhere; on v7x, core_parallel=True forces the batch axis
    # to split across the two TensorCores.
    batch_sem = pltpu.CORE_PARALLEL if core_parallel else "parallel"
    resident = lambda i: (0, 0)   # same block every step -> stays VMEM-resident

    q = pl.pallas_call(
        critic_kernel,
        out_shape=jax.ShapeDtypeStruct((b_pad, OUT), jnp.float32),
        grid_spec=pltpu.PrefetchScalarGridSpec(
            num_scalar_prefetch=0,
            grid=(b_pad // tb,),
            in_specs=[
                pl.BlockSpec((tb, STATE_DIM), lambda i: (i, 0)),    # x tile
                pl.BlockSpec((tb, ACTION_DIM), lambda i: (i, 0)),   # u tile
                pl.BlockSpec((STATE_DIM, H1), resident),            # w1a
                pl.BlockSpec((1, H1), resident),                    # w1b
                pl.BlockSpec((1, H1), resident),                    # b1
                pl.BlockSpec((H1, H2), resident),                   # w2
                pl.BlockSpec((1, H2), resident),                    # b2
                pl.BlockSpec((1, H2), resident),                    # w3 (row)
                pl.BlockSpec((1, 1), resident),                     # b3
            ],
            out_specs=pl.BlockSpec((tb, OUT), lambda i: (i, 0)),
        ),
        compiler_params=pltpu.CompilerParams(
            dimension_semantics=(batch_sem,),
            vmem_limit_bytes=vmem_limit,
        ),
    )(x, u, w1a, w1b, b1, w2, b2, w3r, b3)

    return q[:batch]


def init_params(key):
    """Deterministic parameter init (PyTorch nn.Linear-style uniform bounds)."""
    def linear(key, fan_in, fan_out):
        kw, kb = jax.random.split(key)
        bound = 1.0 / jnp.sqrt(fan_in)
        # stored as [in, out] (transposed vs. PyTorch's [out, in])
        w = jax.random.uniform(kw, (fan_in, fan_out), jnp.float32, -bound, bound)
        b = jax.random.uniform(kb, (1, fan_out), jnp.float32, -bound, bound)
        return w, b

    k1, k2, k3 = jax.random.split(key, 3)
    w1, b1 = linear(k1, STATE_DIM + ACTION_DIM, H1)
    w2, b2 = linear(k2, H1, H2)
    w3, b3 = linear(k3, H2, OUT)
    return (w1, b1, w2, b2, w3, b3)


def reference(x, u, params):
    w1, b1, w2, b2, w3, b3 = params
    h = jnp.concatenate([x, u], axis=1)
    h = jnp.maximum(h @ w1 + b1, 0.0)
    h = jnp.maximum(h @ w2 + b2, 0.0)
    return h @ w3 + b3


if __name__ == "__main__":
    key = jax.random.PRNGKey(0)
    kp, kx, ku = jax.random.split(key, 3)

    params = init_params(kp)
    prepared = prepare_params(params)

    # Small demo batch (single tile, no padding).
    B = 8
    x = jax.random.normal(kx, (B, STATE_DIM), jnp.float32)
    u = jax.random.normal(ku, (B, ACTION_DIM), jnp.float32)

    q = critic_forward(x, u, prepared)
    jax.block_until_ready(q)
    ref = reference(x, u, params)
    assert q.shape == (B, OUT)
    # bf16 MXU operands with f32 accumulation -> relaxed tolerance.
    assert jnp.allclose(q, ref, atol=5e-2, rtol=5e-2), (q, ref)

    # Ragged batch exercising a multi-step grid, balanced tiles and padding.
    B2 = 300
    x2 = jax.random.normal(kx, (B2, STATE_DIM), jnp.float32)
    u2 = jax.random.normal(ku, (B2, ACTION_DIM), jnp.float32)
    q2 = critic_forward(x2, u2, prepared, block_b=128)
    jax.block_until_ready(q2)
    ref2 = reference(x2, u2, params)
    assert q2.shape == (B2, OUT)
    assert jnp.allclose(q2, ref2, atol=5e-2, rtol=5e-2)

    print("KERNEL_OK")
</pallas_src>

<mosaic_0001>
module attributes {stable_mosaic.version = 11 : i64} {
  func.func @critic_kernel(%arg0: i32, %arg1: memref<8x8xf32, #tpu.memory_space<vmem>>, %arg2: memref<8x1xf32, #tpu.memory_space<vmem>>, %arg3: memref<8x256xbf16, #tpu.memory_space<vmem>>, %arg4: memref<1x256xf32, #tpu.memory_space<vmem>>, %arg5: memref<1x256xf32, #tpu.memory_space<vmem>>, %arg6: memref<256x128xbf16, #tpu.memory_space<vmem>>, %arg7: memref<1x128xf32, #tpu.memory_space<vmem>>, %arg8: memref<1x128xf32, #tpu.memory_space<vmem>>, %arg9: memref<1x1xf32, #tpu.memory_space<vmem>>, %arg10: memref<8x1xf32, #tpu.memory_space<vmem>>) attributes {dimension_semantics = [#tpu.dimension_semantics<parallel>], iteration_bounds = array<i64: 1>, scalar_prefetch = 0 : i64, scratch_operands = 0 : i64, tpu.core_type = #tpu.core_type<tc>, window_params = [{transform_indices = @transform_0, window_bounds = array<i64: 8, 8>}, {transform_indices = @transform_1, window_bounds = array<i64: 8, 1>}, {pipeline_mode = #tpu.pipeline_mode<synchronous>, transform_indices = @transform_2, window_bounds = array<i64: 8, 256>}, {pipeline_mode = #tpu.pipeline_mode<synchronous>, transform_indices = @transform_3, window_bounds = array<i64: 1, 256>}, {pipeline_mode = #tpu.pipeline_mode<synchronous>, transform_indices = @transform_4, window_bounds = array<i64: 1, 256>}, {pipeline_mode = #tpu.pipeline_mode<synchronous>, transform_indices = @transform_5, window_bounds = array<i64: 256, 128>}, {pipeline_mode = #tpu.pipeline_mode<synchronous>, transform_indices = @transform_6, window_bounds = array<i64: 1, 128>}, {pipeline_mode = #tpu.pipeline_mode<synchronous>, transform_indices = @transform_7, window_bounds = array<i64: 1, 128>}, {pipeline_mode = #tpu.pipeline_mode<synchronous>, transform_indices = @transform_8, window_bounds = array<i64: 1, 1>}, {transform_indices = @transform_9, window_bounds = array<i64: 8, 1>}]} {
    %c0 = arith.constant 0 : index
    %c0_0 = arith.constant 0 : index
    %0 = vector.load %arg1[%c0, %c0_0] : memref<8x8xf32, #tpu.memory_space<vmem>>, vector<8x8xf32>
    %1 = arith.truncf %0 : vector<8x8xf32> to vector<8x8xbf16>
    %c0_1 = arith.constant 0 : index
    %c0_2 = arith.constant 0 : index
    %2 = vector.load %arg3[%c0_1, %c0_2] : memref<8x256xbf16, #tpu.memory_space<vmem>>, vector<8x256xbf16>
    %cst = arith.constant dense<0.000000e+00> : vector<8x256xf32>
    %3 = tpu.matmul %1, %2, %cst {dimension_numbers = #tpu.dot_dimension_numbers<[1], [0], [0], [1], [0, 0, 1, 1], [], []>} : vector<8x8xbf16>, vector<8x256xbf16>, vector<8x256xf32> -> vector<8x256xf32>
    %c0_3 = arith.constant 0 : index
    %c0_4 = arith.constant 0 : index
    %4 = vector.load %arg2[%c0_3, %c0_4] : memref<8x1xf32, #tpu.memory_space<vmem>>, vector<8x1xf32>
    %c0_5 = arith.constant 0 : index
    %c0_6 = arith.constant 0 : index
    %5 = vector.load %arg4[%c0_5, %c0_6] : memref<1x256xf32, #tpu.memory_space<vmem>>, vector<1x256xf32>
    %6 = vector.broadcast %4 : vector<8x1xf32> to vector<8x256xf32>
    %7 = vector.broadcast %5 : vector<1x256xf32> to vector<8x256xf32>
    %8 = arith.mulf %6, %7 : vector<8x256xf32>
    %9 = arith.addf %3, %8 : vector<8x256xf32>
    %c0_7 = arith.constant 0 : index
    %c0_8 = arith.constant 0 : index
    %10 = vector.load %arg5[%c0_7, %c0_8] : memref<1x256xf32, #tpu.memory_space<vmem>>, vector<1x256xf32>
    %11 = vector.broadcast %10 : vector<1x256xf32> to vector<8x256xf32>
    %12 = arith.addf %9, %11 : vector<8x256xf32>
    %cst_9 = arith.constant 0.000000e+00 : f32
    %13 = vector.broadcast %cst_9 : f32 to vector<8x256xf32>
    %14 = arith.maximumf %12, %13 : vector<8x256xf32>
    %15 = arith.truncf %14 : vector<8x256xf32> to vector<8x256xbf16>
    %c0_10 = arith.constant 0 : index
    %c0_11 = arith.constant 0 : index
    %16 = vector.load %arg6[%c0_10, %c0_11] : memref<256x128xbf16, #tpu.memory_space<vmem>>, vector<256x128xbf16>
    %cst_12 = arith.constant dense<0.000000e+00> : vector<8x128xf32>
    %17 = tpu.matmul %15, %16, %cst_12 {dimension_numbers = #tpu.dot_dimension_numbers<[1], [0], [0], [1], [0, 0, 1, 1], [], []>} : vector<8x256xbf16>, vector<256x128xbf16>, vector<8x128xf32> -> vector<8x128xf32>
    %c0_13 = arith.constant 0 : index
    %c0_14 = arith.constant 0 : index
    %18 = vector.load %arg7[%c0_13, %c0_14] : memref<1x128xf32, #tpu.memory_space<vmem>>, vector<1x128xf32>
    %19 = vector.broadcast %18 : vector<1x128xf32> to vector<8x128xf32>
    %20 = arith.addf %17, %19 : vector<8x128xf32>
    %cst_15 = arith.constant 0.000000e+00 : f32
    %21 = vector.broadcast %cst_15 : f32 to vector<8x128xf32>
    %22 = arith.maximumf %20, %21 : vector<8x128xf32>
    %c0_16 = arith.constant 0 : index
    %c0_17 = arith.constant 0 : index
    %23 = vector.load %arg8[%c0_16, %c0_17] : memref<1x128xf32, #tpu.memory_space<vmem>>, vector<1x128xf32>
    %24 = vector.broadcast %23 : vector<1x128xf32> to vector<8x128xf32>
    %25 = arith.mulf %22, %24 : vector<8x128xf32>
    %cst_18 = arith.constant dense<0.000000e+00> : vector<8xf32>
    %26 = vector.multi_reduction <add>, %25, %cst_18 [1] : vector<8x128xf32> to vector<8xf32>
    %27 = vector.shape_cast %26 : vector<8xf32> to vector<8x1xf32>
    %c0_19 = arith.constant 0 : index
    %c0_20 = arith.constant 0 : index
    %28 = vector.load %arg9[%c0_19, %c0_20] : memref<1x1xf32, #tpu.memory_space<vmem>>, vector<1x1xf32>
    %29 = vector.broadcast %28 : vector<1x1xf32> to vector<8x1xf32>
    %30 = arith.addf %27, %29 : vector<8x1xf32>
    %c0_21 = arith.constant 0 : index
    %c0_22 = arith.constant 0 : index
    %31 = vector.load %arg10[%c0_21, %c0_22] : memref<8x1xf32, #tpu.memory_space<vmem>>, vector<8x1xf32>
    tpu.vector_store %arg10[%c0_21, %c0_22], %30 {strides = array<i32>} : memref<8x1xf32, #tpu.memory_space<vmem>>, vector<8x1xf32>,
    return
  }
  func.func @transform_0(%arg0: i32) -> (i32, i32) {
    %c0_i32 = arith.constant 0 : i32
    %c0_i32_0 = arith.constant 0 : i32
    return %arg0, %c0_i32 : i32, i32
  }
  func.func @transform_1(%arg0: i32) -> (i32, i32) {
    %c0_i32 = arith.constant 0 : i32
    %c0_i32_0 = arith.constant 0 : i32
    return %arg0, %c0_i32 : i32, i32
  }
  func.func @transform_2(%arg0: i32) -> (i32, i32) {
    %c0_i32 = arith.constant 0 : i32
    %c0_i32_0 = arith.constant 0 : i32
    %c0_i32_1 = arith.constant 0 : i32
    return %c0_i32, %c0_i32_0 : i32, i32
  }
  func.func @transform_3(%arg0: i32) -> (i32, i32) {
    %c0_i32 = arith.constant 0 : i32
    %c0_i32_0 = arith.constant 0 : i32
    %c0_i32_1 = arith.constant 0 : i32
    return %c0_i32, %c0_i32_0 : i32, i32
  }
  func.func @transform_4(%arg0: i32) -> (i32, i32) {
    %c0_i32 = arith.constant 0 : i32
    %c0_i32_0 = arith.constant 0 : i32
    %c0_i32_1 = arith.constant 0 : i32
    return %c0_i32, %c0_i32_0 : i32, i32
  }
  func.func @transform_5(%arg0: i32) -> (i32, i32) {
    %c0_i32 = arith.constant 0 : i32
    %c0_i32_0 = arith.constant 0 : i32
    %c0_i32_1 = arith.constant 0 : i32
    return %c0_i32, %c0_i32_0 : i32, i32
  }
  func.func @transform_6(%arg0: i32) -> (i32, i32) {
    %c0_i32 = arith.constant 0 : i32
    %c0_i32_0 = arith.constant 0 : i32
    %c0_i32_1 = arith.constant 0 : i32
    return %c0_i32, %c0_i32_0 : i32, i32
  }
  func.func @transform_7(%arg0: i32) -> (i32, i32) {
    %c0_i32 = arith.constant 0 : i32
    %c0_i32_0 = arith.constant 0 : i32
    %c0_i32_1 = arith.constant 0 : i32
    return %c0_i32, %c0_i32_0 : i32, i32
  }
  func.func @transform_8(%arg0: i32) -> (i32, i32) {
    %c0_i32 = arith.constant 0 : i32
    %c0_i32_0 = arith.constant 0 : i32
    %c0_i32_1 = arith.constant 0 : i32
    return %c0_i32, %c0_i32_0 : i32, i32
  }
  func.func @transform_9(%arg0: i32) -> (i32, i32) {
    %c0_i32 = arith.constant 0 : i32
    %c0_i32_0 = arith.constant 0 : i32
    return %arg0, %c0_i32 : i32, i32
  }
}

</mosaic_0001>

<bundles_post_ra>
// kernel: critic_forward.1
= control target key start
LH: loop header
LB: loop body
LE: loop exit
PB: predicated region body
PF: predicated region fallthrough
CT: control target
= control target key end

     0   :  { %s559_s0 = inlined_call_operand.vmem [shape: f32[8,8], index: 0, kind: input, shape index: {}]   ;;  %s560_s1 = inlined_call_operand.vmem [shape: f32[8,1], index: 1, kind: input, shape index: {}]   ;;  %s561_s2 = inlined_call_operand.hbm [shape: bf16[8,256], index: 2, kind: input, shape index: {}]   ;;  %s562_s3 = inlined_call_operand.vmem [shape: f32[1,256], index: 3, kind: input, shape index: {}]   ;;  %s563_s4 = inlined_call_operand.vmem [shape: f32[1,256], index: 4, kind: input, shape index: {}]   ;;  %s564_s5 = inlined_call_operand.hbm [shape: bf16[256,128], index: 5, kind: input, shape index: {}]   ;;  %s565_s6 = inlined_call_operand.vmem [shape: f32[1,128], index: 6, kind: input, shape index: {}]   ;;  %s566_s7 = inlined_call_operand.vmem [shape: f32[1,128], index: 7, kind: input, shape index: {}]   ;;  %s567_s8 = inlined_call_operand.<no memory space> [shape: f32[1,1], index: 8, kind: input, shape index: {}]   ;;  %s568_s9 = inlined_call_operand.vmem [shape: f32[8,1], index: 9, kind: output, shape index: {}]  }
   0x1   :  { %v14_v0 = vstv %s567_s8 }
   0x2   :  { %15 = vst [vmem:[#allocation2] sm:$0x1] %v14_v0 }
   0x3   :  { %16 = vsyncpa [#allocation4], 0 }
   0x4   :  { %17 = vsyncpa [#allocation6], 0  ;;  %s474_s11 = smov [#allocation3]   ;;  %s475_s13 = smov [#allocation5]  }
   0x5   :  { %s28_s12 = sshll.u32 %s474_s11, 4  ;;  %s41_s14 = sshll.u32 %s475_s13, 4  ;;  %s29_s12 = int_to_ptr.vmem [resolvable:$true] %s28_s12  ;;  %s42_s14 = int_to_ptr.vmem [resolvable:$true] %s41_s14 }
   0x6   :  { %s438_s15 = scalar_lea.vmem %s29_s12, 128  ;;  %p443_p1 = scmp.lt.s32.totalorder %s29_s12, %s29_s12 }
   0x7   :  { %p439_p0 = scmp.ne.s32.totalorder %s29_s12, %s438_s15  ;;  %p444_p2 = scmp.lt.s32.totalorder %s438_s15, %s438_s15 }
   0x9   :  { %p445_p3 = por %p444_p2, %p443_p1 }
   0xb   :  { %p446_p4 = pnand %p445_p3, %p439_p0 }
   0xd   :  { %449 = shalt.err (!%p446_p4)
}
   0xe   :  { %31 = dma.hbm_to_vmem [thread:$0]  %s561_s2, 128, %s29_s12, [#allocation4]  }
   0xf   :  { %s458_s8 = scalar_lea.vmem %s42_s14, 2048  ;;  %p463_p6 = scmp.lt.s32.totalorder %s42_s14, %s42_s14 }
  0x10   :  { %p459_p5 = scmp.ne.s32.totalorder %s42_s14, %s458_s8  ;;  %p464_p7 = scmp.lt.s32.totalorder %s458_s8, %s458_s8 }
  0x12   :  { %p465_p8 = por %p464_p7, %p463_p6 }
  0x14   :  { %p466_p9 = pnand %p465_p8, %p459_p5 }
  0x16   :  { %469 = shalt.err (!%p466_p9)
}
  0x17   :  { %s476_s18 = smov 64   ;;  %s477_s19 = smov 4  }
  0x18   :  { %47 = dma.hbm_to_vmem [thread:$0]  %s564_s5, 2048, %s42_s14, [#allocation6], %s476_s18, %s476_s18, %s477_s19  }
  0x19   :  { %470 = dma.done.wait [#allocation4], 128  }
  0x1a   :  { %471 = vsyncadd [#allocation4], 4294967168 }
  0x1b   :  { %472 = dma.done.wait [#allocation6], 2048  }
  0x1c   :  { %473 = vsyncadd [#allocation6], 4294965248  ;;  %v478_v1 = vmov 0   ;;  %v63_v2 = vld [vmem:[#allocation3] sm:$0xff]  ;;  %vm93_vm0 = vcmask 1043456   ;;  %v416_v11 = vld [vmem:[#allocation5 + $0x70] sm:$0xff]   ;;  %v72_v25 = vlaneseq }
  0x1d   :  { %132 = vmatprep.mubr.bf16.mxu0 %v478_v1  ;;  %411 = vset.pattern.permute.xlu0 %v478_v1  ;;  %v61_v3 = vld [vmem:[%s559_s0] sm:$0xff]  ;;  %v362_v5 = vcombine.high %v63_v2, %v63_v2  ;;  %v361_v6 = vcombine.low %v63_v2, %v63_v2  ;;  %vm89_vm1 = vcmask 64512   ;;  %v418_v13 = vld [vmem:[#allocation5 + $0x68] sm:$0xff]   ;;  %v420_v15 = vld [vmem:[#allocation5 + $0x60] sm:$0xff]   ;;  %vm353_vm2 = vcmask 7168  }
  0x1e   :  { %v64_v4 = vld [vmem:[%s560_s1] sm:$0xff]  ;;  %v62_v10 = vpack.c.bf16 %v61_v3, %v61_v3  ;;  %v419_v14 = vld [vmem:[#allocation5 + $0x28] sm:$0xff]   ;;  %v421_v16 = vld [vmem:[#allocation5 + $0x20] sm:$0xff]   ;;  %v73_v26 = vshrl.u32 %v72_v25, 7 }
  0x1f   :  { %68 = vperm.xlu0 %411, %v64_v4   ;;  %v414_v7 = vld [vmem:[#allocation5 + $0x78] sm:$0xff]   ;;  %363 = vmatprep.subr.msk.bf16.mxu0 %vm93_vm0, %v362_v5  ;;  %v95_v9 = vsel %vm93_vm0, %v361_v6, 0  ;;  %v417_v12 = vld [vmem:[#allocation5 + $0x30] sm:$0xff]   ;;  %v426_v21 = vld [vmem:[#allocation5 + $0x48] sm:$0xff]  }
  0x20   :  { %v415_v8 = vld [vmem:[#allocation5 + $0x38] sm:$0xff]   ;;  %384 = vmatprep.subr.bf16.mxu1 %v414_v7  ;;  %115 = vmatpush1.bf16.msra.mxu0 %v95_v9  ;;  %v424_v19 = vld [vmem:[#allocation5 + $0x50] sm:$0xff]   ;;  %v427_v22 = vld [vmem:[#allocation5 + $0x8] sm:$0xff]   ;;  %v74_v27 = vsub.s32 0, %v73_v26  ;;  %v78_v29 = vsub.s32 1, %v73_v26 }
  0x21   :  { %385 = vmatpush3.bf16.msra.mxu1 %v415_v8  ;;  %v422_v17 = vld [vmem:[#allocation5 + $0x58] sm:$0xff]   ;;  %v425_v20 = vld [vmem:[#allocation5 + $0x10] sm:$0xff]   ;;  %v428_v23 = vld [vmem:[#allocation5 + $0x40] sm:$0xff]  }
  0x22   :  { %386 = vmatprep.subr.bf16.mxu1 %v416_v11  ;;  %v423_v18 = vld [vmem:[#allocation5 + $0x18] sm:$0xff]   ;;  %v429_v24 = vld [vmem:[#allocation5] sm:$0xff]   ;;  %v365_v51 = vld [vmem:[%s565_s6] ss:$0 sm:$0xff] }
  0x23   :  { %364 = vmatmul.mubr.msk.bf16.vlgmr.msra.gmra.mxu0 %vm89_vm1, %v62_v10  ;;  %v65_v28 = vld [vmem:[%s562_s3] sm:$0x3] }
  0x24   :  { %v75_v30 = vrot.slane %v65_v28, %v74_v27  ;;  %v79_v32 = vrot.slane %v65_v28, %v78_v29  ;;  %v141_v33 = vld [vmem:[%s563_s4] sm:$0x3] }
  0x25   :  { %387 = vmatpush3.bf16.msra.mxu1 %v417_v12  ;;  %v146_v36 = vrot.slane %v141_v33, %v74_v27  ;;  %v150_v39 = vrot.slane %v141_v33, %v78_v29  ;;  %v382_v57 = vld [vmem:[%s566_s7] ss:$0 sm:$0xff] }
  0x26   :  { %388 = vmatprep.subr.bf16.mxu1 %v418_v13  ;;  %v383_v60 = vld [vmem:[#allocation2] ss:$0 sm:$0xff] }
  0x29   :  { %389 = vmatpush3.bf16.msra.mxu1 %v419_v14 }
  0x2a   :  { %390 = vmatprep.subr.bf16.mxu1 %v420_v15 }
  0x2d   :  { %391 = vmatpush3.bf16.msra.mxu1 %v421_v16 }
  0x2e   :  { %392 = vmatprep.subr.bf16.mxu1 %v422_v17 }
  0x31   :  { %393 = vmatpush3.bf16.msra.mxu1 %v423_v18 }
  0x32   :  { %394 = vmatprep.subr.bf16.mxu1 %v424_v19 }
  0x35   :  { %395 = vmatpush3.bf16.msra.mxu1 %v425_v20 }
  0x36   :  { %396 = vmatprep.subr.bf16.mxu1 %v426_v21 }
  0x39   :  { %397 = vmatpush3.bf16.msra.mxu1 %v427_v22 }
  0x3a   :  { %398 = vmatprep.subr.bf16.mxu1 %v428_v23 }
  0x3d   :  { %399 = vmatpush3.bf16.msra.mxu1 %v429_v24 }
  0x9a   :  { %v69_v31 = vpop.permute.xlu0 %68 }
  0x9b   :  { %v82_v34 = vmul.f32 %v75_v30, %v69_v31  ;;  %v83_v35 = vmul.f32 %v79_v32, %v69_v31 }
  0xe3   :  { %v134_v37 = vpop.f32.mrf.mxu0 }
  0xe4   :  { %v135_v38 = vadd.f32 %v134_v37, %v82_v34 }
  0xe5   :  { %v136_v40 = vpop.f32.mrf.mxu0 }
  0xe6   :  { %v153_v41 = vadd.f32 %v146_v36, %v135_v38  ;;  %v137_v42 = vadd.f32 %v136_v40, %v83_v35 }
  0xe7   :  { %v138_v43 = vpop.f32.mrf.mxu0 }
  0xe8   :  { %v154_v44 = vadd.f32 %v150_v39, %v137_v42  ;;  %v155_v45 = vmax.f32 %v153_v41, 0.0 }
  0xe9   :  { %v139_v46 = vpop.f32.mrf.mxu0 }
  0xea   :  { %v156_v47 = vmax.f32 %v154_v44, 0.0  ;;  %v157_v49 = vpack.c.bf16 %v155_v45, %v155_v45 }
  0xec   :  { %v158_v48 = vpack.c.bf16 %v156_v47, %v156_v47 }
  0xee   :  { %326 = vmatprep.mubr.bf16.mxu1 %v158_v48 }
  0xef   :  { %327 = vmatmul.mubr.bf16.vlgmr.msra.gmra.mxu1 %v157_v49 }
 0x1af   :  { %v400_v50 = vpop.f32.mrf.mxu1 }
 0x1b1   :  { %v401_v52 = vpop.f32.mrf.mxu1 }
 0x1b2   :  { %v402_v53 = vadd.f32 %v401_v52, %v400_v50 }
 0x1b3   :  { %v403_v54 = vpop.f32.mrf.mxu1 }
 0x1b4   :  { %v329_v55 = vadd.f32 %v402_v53, %v365_v51 }
 0x1b5   :  { %v404_v56 = vpop.f32.mrf.mxu1 }
 0x1b6   :  { %v334_v58 = vmax.f32 %v329_v55, 0.0 }
 0x1b8   :  { %v342_v59 = vmul.f32 %v382_v57, %v334_v58 }
 0x1ba   :  { %343 = vadd.xlane.f32.xlu0 %v342_v59 }
 0x243   :  { %v344_v61 = vpop.xlane.xlu0 %343 }
 0x244   :  { %v352_v62 = vadd.f32 %v383_v60, %v344_v61 }
 0x246   :  { %354 = vst.msk [vmem:[%s568_s9] sm:$0xff] %vm353_vm2, %v352_v62 }
 0x247   :  { %359 = vsyncpa [#allocation4], 1 }
 0x248   :  { %360 = vsyncpa [#allocation6], 1 }

</bundles_post_ra>
